<compile_context>
chip_gen: v7x
topology: tpu7x:2x2x1
jax: 0.10.0
libtpu: 0.0.40
codegen_flags: <defaults>
</compile_context>

<pallas_src>
import jax
import jax.numpy as jnp
from jax.experimental import pallas as pl
from jax.experimental.pallas import tpu as pltpu


def _round_up(x, m):
    return (x + m - 1) // m * m


def custom_clip_kernel(scale_ref, img_ref, wimg_ref, w1_ref, w2_ref, txt_ref,
                       out_ref, feat_acc):
    # scale_ref: (1,)         exp(logit_scale), SMEM scalar (pre-exp'd)
    # img_ref:   (TN, TP)     bf16 flattened-pixel tile
    # wimg_ref:  (TP, D)      bf16 synthetic image-encoder projection tile
    # w1_ref:    (D, R)       bf16 Adapter fc[0] weight (no bias)
    # w2_ref:    (R, D)       bf16 Adapter fc[2] weight (no bias)
    # txt_ref:   (D, Kp)      bf16 pre-normalized, pre-transposed text feats
    # out_ref:   (TN, Kp)     f32 logits tile (lane-dense, Kp % 128 == 0)
    # feat_acc:  (TN, D)      f32 VMEM accumulator for image_features
    k = pl.program_id(1)

    @pl.when(k == 0)
    def _init():
        feat_acc[...] = jnp.zeros_like(feat_acc)

    # --- image encoder (stand-in linear projection), streamed over P ---
    feat_acc[...] += jnp.dot(img_ref[...], wimg_ref[...],
                             preferred_element_type=jnp.float32)

    @pl.when(k == pl.num_programs(1) - 1)
    def _finalize():
        image_features = feat_acc[...]                                   # (TN, D)

        # --- Adapter: Linear -> ReLU -> Linear -> ReLU (bf16 MXU, f32 acc) ---
        h = jnp.dot(image_features.astype(jnp.bfloat16), w1_ref[...],
                    preferred_element_type=jnp.float32)                  # (TN, R)
        h = jnp.maximum(h, 0.0)
        x = jnp.dot(h.astype(jnp.bfloat16), w2_ref[...],
                    preferred_element_type=jnp.float32)                  # (TN, D)
        x = jnp.maximum(x, 0.0)

        # --- residual blend: ratio * x + (1 - ratio) * image_features ---
        ratio = 0.2
        feats = ratio * x + (1.0 - ratio) * image_features               # (TN, D)

        # --- L2 normalize (rsqrt on EUP); fold exp(logit_scale) into the
        #     image factor so no extra multiply over the (TN, Kp) output.
        #     NOTE: approximate rsqrt(ss + 1e-12) vs exact norm in PyTorch;
        #     well inside the 2e-2 tolerance, and the eps keeps zero-padded
        #     rows finite (0 * rsqrt(eps) = 0). ---
        eps = 1e-12
        fss = jnp.sum(feats * feats, axis=-1, keepdims=True)
        feats = feats * (scale_ref[0] * jax.lax.rsqrt(fss + eps))

        # --- logits = scaled image_features @ text_features.T; text is
        #     pre-normalized and stored (D, Kp), so this is a plain MXU
        #     (M,K)x(K,N) matmul with bf16 operands / f32 accumulation ---
        out_ref[...] = jnp.dot(feats.astype(jnp.bfloat16), txt_ref[...],
                               preferred_element_type=jnp.float32)


def prepare_custom_clip_params(w_img, w1, w2, text_features, logit_scale,
                               *, tile_p=2048):
    """One-time (out of the hot path) weight prep: cast, pad, normalize text,
    transpose text to the MXU-native (D, Kp) layout, pre-exp the logit scale."""
    P, D = w_img.shape
    K = text_features.shape[0]

    tile_p = max(128, _round_up(tile_p, 128))
    tile_p = min(tile_p, _round_up(P, 128))
    Pp = _round_up(P, tile_p)
    Kp = _round_up(K, 128)                                # lane-dense output

    # W_img: only materialize a padded copy if P is not tile-aligned.
    if Pp == P:
        wimg_p = w_img.astype(jnp.bfloat16)
    else:
        wimg_p = jnp.zeros((Pp, D), jnp.bfloat16).at[:P, :].set(
            w_img.astype(jnp.bfloat16))

    # Text: L2-normalize once here (hoisted out of the kernel), transpose to
    # (D, Kp) bf16. Zero-padded class columns produce 0 logits (sliced off).
    txt = text_features.astype(jnp.float32)
    txt = txt * jax.lax.rsqrt(jnp.sum(txt * txt, axis=-1, keepdims=True) + 1e-12)
    txt_t = jnp.zeros((D, Kp), jnp.bfloat16).at[:, :K].set(
        txt.T.astype(jnp.bfloat16))

    scale = jnp.exp(jnp.asarray(logit_scale, jnp.float32)).reshape(1)

    return dict(
        wimg=wimg_p, w1=w1.astype(jnp.bfloat16), w2=w2.astype(jnp.bfloat16),
        txt_t=txt_t, scale=scale,
        tile_p=tile_p, P=P, Pp=Pp, D=D, R=w1.shape[1], K=K, Kp=Kp)


def custom_clip_forward(image, params, *, tile_n=256):
    """image: (N, C, H, W) float32, params from prepare_custom_clip_params.
    Returns logits (N, K) float32."""
    N = image.shape[0]
    img_flat = image.reshape(N, -1).astype(jnp.bfloat16)   # (N, P) glue reshape

    P, Pp, tile_p = params["P"], params["Pp"], params["tile_p"]
    D, R, K, Kp = params["D"], params["R"], params["K"], params["Kp"]
    assert img_flat.shape[1] == P

    # tile_n: multiple of 16 (bf16 sublane packing); shrink for small N; and
    # keep >=2 row tiles when N allows it so v7x's 2 TensorCores both work.
    tile_n = max(16, _round_up(tile_n, 16))
    tile_n = min(tile_n, _round_up(N, 16))
    if N >= 32:
        tile_n = min(tile_n, _round_up((N + 1) // 2, 16))
    Np = _round_up(N, tile_n)

    # Only build a padded image copy if shapes are not already aligned.
    if (Np, Pp) == (N, P):
        img_p = img_flat
    else:
        img_p = jnp.zeros((Np, Pp), jnp.bfloat16).at[:N, :P].set(img_flat)

    grid = (Np // tile_n, Pp // tile_p)

    # Advisory cost estimate: projection + adapter + logits; W_img streamed
    # once per row tile.
    flops = 2 * N * P * D + 4 * N * D * R + 2 * N * D * Kp
    bytes_accessed = (N * P * 2                      # image (bf16)
                      + grid[0] * Pp * D * 2         # W_img, re-streamed per row tile
                      + (D * R + R * D + D * Kp) * 2  # adapter + text (resident)
                      + Np * Kp * 4)                 # logits out
    cost = pl.CostEstimate(flops=flops, transcendentals=N,
                           bytes_accessed=bytes_accessed)

    # TODO(synk): the constant-index inputs (w1/w2/txt) could drop to a single
    # pipeline buffer (pl.Buffered(1)) to shave ~0.5 MiB VMEM; left at the
    # default double-buffering for robustness.
    out_padded = pl.pallas_call(
        custom_clip_kernel,
        out_shape=jax.ShapeDtypeStruct((Np, Kp), jnp.float32),
        grid=grid,
        in_specs=[
            pl.BlockSpec(memory_space=pltpu.MemorySpace.SMEM),       # exp(logit_scale)
            pl.BlockSpec((tile_n, tile_p), lambda i, k: (i, k)),     # image tile
            pl.BlockSpec((tile_p, D), lambda i, k: (k, 0)),          # W_img tile
            pl.BlockSpec((D, R), lambda i, k: (0, 0)),               # adapter fc1 (resident)
            pl.BlockSpec((R, D), lambda i, k: (0, 0)),               # adapter fc2 (resident)
            pl.BlockSpec((D, Kp), lambda i, k: (0, 0)),              # text feats (D, Kp, resident)
        ],
        out_specs=pl.BlockSpec((tile_n, Kp), lambda i, k: (i, 0)),
        scratch_shapes=[pltpu.VMEM((tile_n, D), jnp.float32)],       # feat accumulator
        compiler_params=pltpu.CompilerParams(
            dimension_semantics=("parallel", "arbitrary"),
            vmem_limit_bytes=48 * 1024 * 1024),
        cost_estimate=cost,
    )(params["scale"], img_p, params["wimg"], params["w1"], params["w2"],
      params["txt_t"])

    return out_padded[:N, :K]


if __name__ == "__main__":
    # Small, module-consistent shapes: ViT-like branch -> feature dim 512,
    # Adapter reduction 4 -> hidden 128.
    N, C, H, W = 2, 3, 16, 16          # batch of NCHW images
    D = 512                            # CLIP feature dim (non-RN50 branch)
    R = D // 4                         # Adapter bottleneck
    K = 8                              # number of classes

    key = jax.random.PRNGKey(0)
    k_img, k_wimg, k_w1, k_w2, k_txt = jax.random.split(key, 5)

    image = jax.random.normal(k_img, (N, C, H, W), jnp.float32)
    w_img = jax.random.normal(k_wimg, (C * H * W, D), jnp.float32) * 0.02
    w1 = jax.random.normal(k_w1, (D, R), jnp.float32) * 0.05      # fc[0].weight.T
    w2 = jax.random.normal(k_w2, (R, D), jnp.float32) * 0.05      # fc[2].weight.T
    text_features = jax.random.normal(k_txt, (K, D), jnp.float32)
    logit_scale = jnp.log(jnp.float32(1.0 / 0.07))                # CLIP default

    # tile_p=256 so the toy run exercises the P-reduction accumulator (3 steps)
    params = prepare_custom_clip_params(w_img, w1, w2, text_features,
                                        logit_scale, tile_p=256)
    logits = custom_clip_forward(image, params)
    jax.block_until_ready(logits)

    # Pure-JAX reference mirroring the kernel's bf16-operand / f32-accumulate
    # dtype flow for the big matmuls (final logits matmul kept in f32 to check
    # the kernel's bf16 logits path stays within tolerance).
    def ref():
        imgf = image.reshape(N, -1).astype(jnp.bfloat16)
        f = jnp.dot(imgf, w_img.astype(jnp.bfloat16),
                    preferred_element_type=jnp.float32)
        h = jnp.maximum(jnp.dot(f.astype(jnp.bfloat16), w1.astype(jnp.bfloat16),
                                preferred_element_type=jnp.float32), 0.0)
        a = jnp.maximum(jnp.dot(h.astype(jnp.bfloat16), w2.astype(jnp.bfloat16),
                                preferred_element_type=jnp.float32), 0.0)
        f2 = 0.2 * a + 0.8 * f
        f2 = f2 / jnp.linalg.norm(f2, axis=-1, keepdims=True)
        t = text_features / jnp.linalg.norm(text_features, axis=-1,
                                            keepdims=True)
        return jnp.exp(logit_scale) * (f2 @ t.T)

    r = ref()
    assert logits.shape == (N, K)
    assert jnp.allclose(logits, r, rtol=2e-2, atol=2e-2), \
        float(jnp.max(jnp.abs(logits - r)))
    print("KERNEL_OK")
</pallas_src>

<mosaic_0001>
module attributes {stable_mosaic.version = 11 : i64} {
  func.func @custom_clip_kernel(%arg0: i32, %arg1: i32, %arg2: memref<1xf32, #tpu.memory_space<smem>>, %arg3: memref<16x256xbf16, #tpu.memory_space<vmem>>, %arg4: memref<256x512xbf16, #tpu.memory_space<vmem>>, %arg5: memref<512x128xbf16, #tpu.memory_space<vmem>>, %arg6: memref<128x512xbf16, #tpu.memory_space<vmem>>, %arg7: memref<512x128xbf16, #tpu.memory_space<vmem>>, %arg8: memref<16x128xf32, #tpu.memory_space<vmem>>, %arg9: memref<16x512xf32, #tpu.memory_space<vmem>>) attributes {dimension_semantics = [#tpu.dimension_semantics<parallel>, #tpu.dimension_semantics<arbitrary>], iteration_bounds = array<i64: 1, 3>, scalar_prefetch = 0 : i64, scratch_operands = 1 : i64, tpu.core_type = #tpu.core_type<tc>, window_params = [{transform_indices = @transform_0, window_bounds = array<i64: 1>}, {transform_indices = @transform_1, window_bounds = array<i64: 16, 256>}, {transform_indices = @transform_2, window_bounds = array<i64: 256, 512>}, {pipeline_mode = #tpu.pipeline_mode<synchronous>, transform_indices = @transform_3, window_bounds = array<i64: 512, 128>}, {pipeline_mode = #tpu.pipeline_mode<synchronous>, transform_indices = @transform_4, window_bounds = array<i64: 128, 512>}, {pipeline_mode = #tpu.pipeline_mode<synchronous>, transform_indices = @transform_5, window_bounds = array<i64: 512, 128>}, {transform_indices = @transform_6, window_bounds = array<i64: 16, 128>}]} {
    %c0_i32 = arith.constant 0 : i32
    %0 = arith.cmpi eq, %arg1, %c0_i32 : i32
    %1 = arith.extui %0 : i1 to i32
    %c0_i32_0 = arith.constant 0 : i32
    %2 = arith.cmpi ne, %1, %c0_i32_0 : i32
    scf.if %2 {
      %cst_9 = arith.constant 0.000000e+00 : f32
      %12 = vector.broadcast %cst_9 : f32 to vector<16x512xf32>
      %c0_10 = arith.constant 0 : index
      %c0_11 = arith.constant 0 : index
      %13 = vector.load %arg9[%c0_10, %c0_11] : memref<16x512xf32, #tpu.memory_space<vmem>>, vector<16x512xf32>
      tpu.vector_store %arg9[%c0_10, %c0_11], %12 {strides = array<i32>} : memref<16x512xf32, #tpu.memory_space<vmem>>, vector<16x512xf32>,
    } else {
    }
    %c0 = arith.constant 0 : index
    %c0_1 = arith.constant 0 : index
    %3 = vector.load %arg9[%c0, %c0_1] : memref<16x512xf32, #tpu.memory_space<vmem>>, vector<16x512xf32>
    %c0_2 = arith.constant 0 : index
    %c0_3 = arith.constant 0 : index
    %4 = vector.load %arg3[%c0_2, %c0_3] : memref<16x256xbf16, #tpu.memory_space<vmem>>, vector<16x256xbf16>
    %c0_4 = arith.constant 0 : index
    %c0_5 = arith.constant 0 : index
    %5 = vector.load %arg4[%c0_4, %c0_5] : memref<256x512xbf16, #tpu.memory_space<vmem>>, vector<256x512xbf16>
    %cst = arith.constant dense<0.000000e+00> : vector<16x512xf32>
    %6 = tpu.matmul %4, %5, %cst {dimension_numbers = #tpu.dot_dimension_numbers<[1], [0], [0], [1], [0, 0, 1, 1], [], []>} : vector<16x256xbf16>, vector<256x512xbf16>, vector<16x512xf32> -> vector<16x512xf32>
    %7 = arith.addf %3, %6 : vector<16x512xf32>
    %c0_6 = arith.constant 0 : index
    %c0_7 = arith.constant 0 : index
    %8 = vector.load %arg9[%c0_6, %c0_7] : memref<16x512xf32, #tpu.memory_space<vmem>>, vector<16x512xf32>
    tpu.vector_store %arg9[%c0_6, %c0_7], %7 {strides = array<i32>} : memref<16x512xf32, #tpu.memory_space<vmem>>, vector<16x512xf32>,
    %c2_i32 = arith.constant 2 : i32
    %9 = arith.cmpi eq, %arg1, %c2_i32 : i32
    %10 = arith.extui %9 : i1 to i32
    %c0_i32_8 = arith.constant 0 : i32
    %11 = arith.cmpi ne, %10, %c0_i32_8 : i32
    scf.if %11 {
      %c0_9 = arith.constant 0 : index
      %c0_10 = arith.constant 0 : index
      %12 = vector.load %arg9[%c0_9, %c0_10] : memref<16x512xf32, #tpu.memory_space<vmem>>, vector<16x512xf32>
      %13 = arith.truncf %12 : vector<16x512xf32> to vector<16x512xbf16>
      %c0_11 = arith.constant 0 : index
      %c0_12 = arith.constant 0 : index
      %14 = vector.load %arg5[%c0_11, %c0_12] : memref<512x128xbf16, #tpu.memory_space<vmem>>, vector<512x128xbf16>
      %cst_13 = arith.constant dense<0.000000e+00> : vector<16x128xf32>
      %15 = tpu.matmul %13, %14, %cst_13 {dimension_numbers = #tpu.dot_dimension_numbers<[1], [0], [0], [1], [0, 0, 1, 1], [], []>} : vector<16x512xbf16>, vector<512x128xbf16>, vector<16x128xf32> -> vector<16x128xf32>
      %cst_14 = arith.constant 0.000000e+00 : f32
      %16 = vector.broadcast %cst_14 : f32 to vector<16x128xf32>
      %17 = arith.maximumf %15, %16 : vector<16x128xf32>
      %18 = arith.truncf %17 : vector<16x128xf32> to vector<16x128xbf16>
      %c0_15 = arith.constant 0 : index
      %c0_16 = arith.constant 0 : index
      %19 = vector.load %arg6[%c0_15, %c0_16] : memref<128x512xbf16, #tpu.memory_space<vmem>>, vector<128x512xbf16>
      %cst_17 = arith.constant dense<0.000000e+00> : vector<16x512xf32>
      %20 = tpu.matmul %18, %19, %cst_17 {dimension_numbers = #tpu.dot_dimension_numbers<[1], [0], [0], [1], [0, 0, 1, 1], [], []>} : vector<16x128xbf16>, vector<128x512xbf16>, vector<16x512xf32> -> vector<16x512xf32>
      %cst_18 = arith.constant 0.000000e+00 : f32
      %21 = vector.broadcast %cst_18 : f32 to vector<16x512xf32>
      %22 = arith.maximumf %20, %21 : vector<16x512xf32>
      %cst_19 = arith.constant 2.000000e-01 : f32
      %23 = vector.broadcast %cst_19 : f32 to vector<16x512xf32>
      %24 = arith.mulf %23, %22 : vector<16x512xf32>
      %cst_20 = arith.constant 8.000000e-01 : f32
      %25 = vector.broadcast %cst_20 : f32 to vector<16x512xf32>
      %26 = arith.mulf %25, %12 : vector<16x512xf32>
      %27 = arith.addf %24, %26 : vector<16x512xf32>
      %28 = arith.mulf %27, %27 : vector<16x512xf32>
      %cst_21 = arith.constant dense<0.000000e+00> : vector<16xf32>
      %29 = vector.multi_reduction <add>, %28, %cst_21 [1] : vector<16x512xf32> to vector<16xf32>
      %30 = vector.shape_cast %29 : vector<16xf32> to vector<16x1xf32>
      %c0_22 = arith.constant 0 : index
      %31 = memref.load %arg2[%c0_22] : memref<1xf32, #tpu.memory_space<smem>>
      %cst_23 = arith.constant 9.99999996E-13 : f32
      %32 = vector.broadcast %cst_23 : f32 to vector<16x1xf32>
      %33 = arith.addf %30, %32 : vector<16x1xf32>
      %34 = math.rsqrt %33 : vector<16x1xf32>
      %35 = vector.broadcast %31 : f32 to vector<16x1xf32>
      %36 = arith.mulf %35, %34 : vector<16x1xf32>
      %37 = vector.broadcast %36 : vector<16x1xf32> to vector<16x512xf32>
      %38 = arith.mulf %27, %37 : vector<16x512xf32>
      %39 = arith.truncf %38 : vector<16x512xf32> to vector<16x512xbf16>
      %c0_24 = arith.constant 0 : index
      %c0_25 = arith.constant 0 : index
      %40 = vector.load %arg7[%c0_24, %c0_25] : memref<512x128xbf16, #tpu.memory_space<vmem>>, vector<512x128xbf16>
      %cst_26 = arith.constant dense<0.000000e+00> : vector<16x128xf32>
      %41 = tpu.matmul %39, %40, %cst_26 {dimension_numbers = #tpu.dot_dimension_numbers<[1], [0], [0], [1], [0, 0, 1, 1], [], []>} : vector<16x512xbf16>, vector<512x128xbf16>, vector<16x128xf32> -> vector<16x128xf32>
      %c0_27 = arith.constant 0 : index
      %c0_28 = arith.constant 0 : index
      %42 = vector.load %arg8[%c0_27, %c0_28] : memref<16x128xf32, #tpu.memory_space<vmem>>, vector<16x128xf32>
      tpu.vector_store %arg8[%c0_27, %c0_28], %41 {strides = array<i32>} : memref<16x128xf32, #tpu.memory_space<vmem>>, vector<16x128xf32>,
    } else {
    }
    return
  }
  func.func @transform_0(%arg0: i32, %arg1: i32) -> i32 {
    %c0_i32 = arith.constant 0 : i32
    %c0_i32_0 = arith.constant 0 : i32
    return %c0_i32 : i32
  }
  func.func @transform_1(%arg0: i32, %arg1: i32) -> (i32, i32) {
    %c0_i32 = arith.constant 0 : i32
    return %arg0, %arg1 : i32, i32
  }
  func.func @transform_2(%arg0: i32, %arg1: i32) -> (i32, i32) {
    %c0_i32 = arith.constant 0 : i32
    %c0_i32_0 = arith.constant 0 : i32
    return %arg1, %c0_i32 : i32, i32
  }
  func.func @transform_3(%arg0: i32, %arg1: i32) -> (i32, i32) {
    %c0_i32 = arith.constant 0 : i32
    %c0_i32_0 = arith.constant 0 : i32
    %c0_i32_1 = arith.constant 0 : i32
    return %c0_i32, %c0_i32_0 : i32, i32
  }
  func.func @transform_4(%arg0: i32, %arg1: i32) -> (i32, i32) {
    %c0_i32 = arith.constant 0 : i32
    %c0_i32_0 = arith.constant 0 : i32
    %c0_i32_1 = arith.constant 0 : i32
    return %c0_i32, %c0_i32_0 : i32, i32
  }
  func.func @transform_5(%arg0: i32, %arg1: i32) -> (i32, i32) {
    %c0_i32 = arith.constant 0 : i32
    %c0_i32_0 = arith.constant 0 : i32
    %c0_i32_1 = arith.constant 0 : i32
    return %c0_i32, %c0_i32_0 : i32, i32
  }
  func.func @transform_6(%arg0: i32, %arg1: i32) -> (i32, i32) {
    %c0_i32 = arith.constant 0 : i32
    %c0_i32_0 = arith.constant 0 : i32
    return %arg0, %c0_i32 : i32, i32
  }
}

</mosaic_0001>

<bundles_post_ra>
// kernel: tpu_custom_call.1
= control target key start
LH: loop header
LB: loop body
LE: loop exit
PB: predicated region body
PF: predicated region fallthrough
CT: control target
= control target key end

     0   :  { %s3396_s0 = inlined_call_operand.<no memory space> [shape: f32[1], index: 0, kind: input, shape index: {}]   ;;  %s3397_s1 = inlined_call_operand.hbm [shape: bf16[16,768], index: 1, kind: input, shape index: {}]   ;;  %s3398_s2 = inlined_call_operand.hbm [shape: bf16[768,512], index: 2, kind: input, shape index: {}]   ;;  %s3399_s3 = inlined_call_operand.hbm [shape: bf16[512,128], index: 3, kind: input, shape index: {}]   ;;  %s3400_s4 = inlined_call_operand.hbm [shape: bf16[128,512], index: 4, kind: input, shape index: {}]   ;;  %s3401_s5 = inlined_call_operand.hbm [shape: bf16[512,128], index: 5, kind: input, shape index: {}]   ;;  %s3402_s6 = inlined_call_operand.hbm [shape: f32[16,128], index: 6, kind: output, shape index: {}]  }
   0x1   :  { %3411 = sst [smem:[#allocation19_spill]] %s3397_s1 }
   0x2   :  { %3412 = sst [smem:[#allocation20_spill]] %s3399_s3 }
   0x3   :  { %3413 = sst [smem:[#allocation21_spill]] %s3400_s4 }
   0x4   :  { %11 = sst [smem:[#allocation3]] %s3396_s0 }
   0x5   :  { %12 = vsyncpa [#allocation5], 0 }
   0x6   :  { %14 = vsyncpa [#allocation5 + $0x1], 0 }
   0x7   :  { %15 = vsyncpa [#allocation8], 0 }
   0x8   :  { %17 = vsyncpa [#allocation8 + $0x1], 0 }
   0x9   :  { %18 = vsyncpa [#allocation11], 0 }
   0xa   :  { %19 = vsyncpa [#allocation6], 0  ;;  %s2955_s23 = smov 0   ;;  %s2957_s24 = smov 0  }
   0xb   :  { %s2959_s25 = smov 0   ;;  %s2961_s26 = smov 0  }
   0xc   :  { %s2963_s27 = smov 0   ;;  %s2965_s28 = smov 0  }
   0xd LB: > { %s2984_s0 = sadd.s32 4294967295, %s2898_s28   ;;  %p74_p0 = scmp.ne.s32.totalorder %s2886_s25, %s2882_s24  ;;  %s2898_s28 = sphi %s2965_s28, %s25_s28   ;;  %s2894_s27 = sphi %s2963_s27, %s3439_s27   ;;  %s2890_s26 = sphi %s2961_s26, %s3438_s26   ;;  %s2886_s25 = sphi %s2959_s25, %s3437_s25   ;;  %s2882_s24 = sphi %s2957_s24, %s3436_s24   ;;  %s2878_s23 = sphi %s2955_s23, %s3435_s23  }
   0xe   : > { %p75_p1 = scmp.eq.s32.totalorder %s2898_s28, 0  ;;  %p80_p2 = scmp.ne.s32.totalorder %s2882_s24, %s2878_s23 }
   0xf   : > { %p3403_p3 = scmp.eq.s32.totalorder %s2984_s0, 0  ;;  %p2061_p5 = scmp.ge.s32.totalorder %s2898_s28, 1 }
  0x10   : > { %p76_p4 = por %p75_p1, %p74_p0  ;;  %p206_p7 = scmp.lt.s32.totalorder %s2898_s28, 4 }
  0x11   : > { %p2995_p6 = por %p3403_p3, %p80_p2  ;;  %s2900_s8 = smov [#allocation9]  }
  0x12   : > { %p3000_p8 = pnand %p2061_p5, %p206_p7  ;;  %s221_s9 = sshll.u32 %s2900_s8, 4  ;;  %s3004_s9 = int_to_ptr.vmem [resolvable:$true] %s221_s9 }
  0x13   : > { %s3414_s30 = scalar_select %p2995_p6, 1, 0 }
  0x14   : > { %s3415_s7 = scalar_select %p3000_p8, 1, 0 }
  0x15   : > { %p2358_p9 = pneg %p3000_p8  ;;  %p2378_p10 = scmp.lt.s32.totalorder %s2898_s28, 3 }
  0x16   : > { %s2901_s12 = smov [#allocation10]   ;;  %s3418_s3 = sld [smem:[#allocation20_spill]] }
  0x17   : > { %p3011_p11 = pnand %p2358_p9, %p3403_p3  ;;  %p3015_p12 = pnand %p2378_p10, %p76_p4 }
  0x18   : > { %s234_s13 = sshll.u32 %s2901_s12, 4  ;;  %s3019_s13 = int_to_ptr.vmem [resolvable:$true] %s234_s13 }
  0x19   : > { %s3417_s11 = scalar_select %p3015_p12, 1, 0 }
  0x1a   : > { %p3029_p0 = pneg %p3011_p11 }
  0x1c   : > { %s2662_s16 = scalar_lea.hbm %s3418_s3, 4096 }
  0x1d   : > { %p2663_p13 = scmp.ne.s32.totalorder %s3418_s3, %s2662_s16  ;;  %p2669_p4 = scmp.lt.u32.totalorder %s2662_s16, %s3418_s3 }
  0x1f   : > { %p2665_p1 = pnand %p3029_p0, %p2663_p13 }
  0x21   : > { %p2666_p2 = pneg %p2665_p1 }
  0x23   : > { %p2671_p5 = pnand %p2669_p4, %p2666_p2 }
  0x25   : > { %2674 = shalt.err (!%p2671_p5)
}
  0x26   : > { %s2675_s22 = scalar_lea.vmem %s3004_s9, 4096  ;;  %p2683_p3 = scmp.lt.s32.totalorder %s3004_s9, %s3004_s9 }
  0x27   : > { %p2676_p7 = scmp.ne.s32.totalorder %s3004_s9, %s2675_s22  ;;  %p2684_p6 = scmp.lt.s32.totalorder %s2675_s22, %s2675_s22 }
  0x29   : > { %p2678_p9 = pnand %p2676_p7, %p3029_p0  ;;  %p2685_p13 = por %p2684_p6, %p2683_p3 }
  0x2b   : > { %p2679_p10 = pneg %p2678_p9 }
  0x2d   : > { %p2686_p1 = pnand %p2685_p13, %p2679_p10 }
  0x2f   : > { %2689 = shalt.err (!%p2686_p1)
}
  0x30   : > { %s3405_s23 = smov 64   ;;  %s3406_s8 = smov 4  }
  0x31   : > { %2361 = dma.hbm_to_vmem [thread:$0]  (!%p3011_p11), %s3418_s3, 4096, %s3004_s9, [#allocation8], %s3405_s23, %s3405_s23, %s3406_s8  }
  0x32   : > { %s3420_s4 = sld [smem:[#allocation21_spill]] }
  0x38   : > { %s2690_s17 = scalar_lea.hbm %s3420_s4, 4096 }
  0x39   : > { %p2691_p3 = scmp.ne.s32.totalorder %s3420_s4, %s2690_s17  ;;  %p2697_p4 = scmp.lt.u32.totalorder %s2690_s17, %s3420_s4 }
  0x3b   : > { %p2693_p6 = pnand %p2691_p3, %p3029_p0 }
  0x3d   : > { %p2694_p2 = pneg %p2693_p6 }
  0x3f   : > { %p2699_p5 = pnand %p2697_p4, %p2694_p2 }
  0x41   : > { %2702 = shalt.err (!%p2699_p5)
}
  0x42   : > { %s2703_s9 = scalar_lea.vmem %s3019_s13, 4096  ;;  %p2711_p13 = scmp.lt.s32.totalorder %s3019_s13, %s3019_s13 }
  0x43   : > { %p2704_p7 = scmp.ne.s32.totalorder %s3019_s13, %s2703_s9  ;;  %p2712_p1 = scmp.lt.s32.totalorder %s2703_s9, %s2703_s9 }
  0x45   : > { %p2706_p9 = pnand %p2704_p7, %p3029_p0  ;;  %p2713_p3 = por %p2712_p1, %p2711_p13 }
  0x47   : > { %p2707_p10 = pneg %p2706_p9 }
  0x49   : > { %p2714_p6 = pnand %p2713_p3, %p2707_p10 }
  0x4b   : > { %2717 = shalt.err (!%p2714_p6)
}
  0x4c   : > { %s3409_s12 = smov 256   ;;  %s3410_s14 = smov 16  }
  0x4d   : > { %2364 = dma.hbm_to_vmem [thread:$0]  (!%p3011_p11), %s3420_s4, 4096, %s3019_s13, [#allocation11], %s3409_s12, %s3409_s12, %s3410_s14  }
  0x4e   : > { %s2906_s17 = smov [#allocation12]   ;;  %s2718_s22 = scalar_lea.hbm %s3401_s5, 4096 }
  0x4f   : > { %s247_s18 = sshll.u32 %s2906_s17, 4  ;;  %p2719_p2 = scmp.ne.s32.totalorder %s3401_s5, %s2718_s22  ;;  %s248_s18 = int_to_ptr.vmem [resolvable:$true] %s247_s18 }
  0x50   : > { %p2725_p7 = scmp.lt.u32.totalorder %s2718_s22, %s3401_s5 }
  0x51   : > { %p2721_p4 = pnand %p2719_p2, %p3029_p0 }
  0x53   : > { %p2722_p5 = pneg %p2721_p4 }
  0x55   : > { %p2727_p9 = pnand %p2725_p7, %p2722_p5 }
  0x57   : > { %2730 = shalt.err (!%p2727_p9)
}
  0x58   : > { %s2731_s13 = scalar_lea.vmem %s248_s18, 4096  ;;  %p2739_p3 = scmp.lt.s32.totalorder %s248_s18, %s248_s18 }
  0x59   : > { %p2732_p10 = scmp.ne.s32.totalorder %s248_s18, %s2731_s13  ;;  %p2740_p6 = scmp.lt.s32.totalorder %s2731_s13, %s2731_s13 }
  0x5b   : > { %p2734_p13 = pnand %p2732_p10, %p3029_p0  ;;  %p2741_p8 = por %p2740_p6, %p2739_p3 }
  0x5d   : > { %p2735_p1 = pneg %p2734_p13 }
  0x5f   : > { %p2742_p12 = pnand %p2741_p8, %p2735_p1 }
  0x61   : > { %2745 = shalt.err (!%p2742_p12)
}
  0x62   : > { %s3421_s29 = smov 4   ;;  %s3422_s15 = smov 64  }
  0x63   : > { %2367 = dma.hbm_to_vmem [thread:$0]  (!%p3011_p11), %s3401_s5, 4096, %s248_s18, [#allocation11], %s3422_s15, %s3422_s15, %s3421_s29  }
  0x64   : > { %s34_s19 = sadd.s32 1, %s2894_s27  ;;  %s3102_s16 = sand.u32 1, %s2886_s25  }
  0x65   : > { %p35_p8 = scmp.ge.s32.totalorder %s34_s19, 3  ;;  %s2066_s10 = sshll.u32 %s3102_s16, 4 }
  0x66   : > { %s2247_s17 = sshll.u32 %s2894_s27, 7  ;;  %s3423_s1 = sld [smem:[#allocation19_spill]] }
  0x67   : > { %s3441_s19 = smov (%p35_p8, %s34_s19), 0  ;;  %s265_s9 = scalar_lea.vmem [#allocation4], %s2066_s10 }
  0x68   : > { %s63_s18 = ssub.s32 %s2894_s27, %s3441_s19  ;;  %s275_s13 = sshll.u32 %s265_s9, 4  ;;  %s3115_s13 = int_to_ptr.vmem [resolvable:$true] %s275_s13 }
  0x69   : > { %p65_p11 = scmp.eq.s32.totalorder %s63_s18, 0  ;;  %s3424_s29 = sadd.s32 1, %s2886_s25 }
  0x6a   : > { %s262_s8 = scalar_lea.sflag [#allocation5], %s3102_s16  ;;  %p3425_p0 = scmp.ne.s32.totalorder %s3417_s11, 0 }
  0x6b   : > { %s3120_s15 = scalar_select %p65_p11, %s2886_s25, %s3424_s29  }
  0x6c   : > { %s3111_s22 = scalar_lea.hbm %s3423_s1, %s2247_s17  ;;  %p2748_p2 = pneg %p3425_p0 }
  0x6d   : > { %s2746_s12 = scalar_lea.hbm %s3111_s22, 256  ;;  %s2751_s20 = scalar_lea.hbm %s3423_s1, 768 }
  0x6e   : > { %p2747_p12 = scmp.ne.s32.totalorder %s3111_s22, %s2746_s12  ;;  %p2752_p7 = scmp.lt.u32.totalorder %s3111_s22, %s3423_s1 }
  0x6f   : > { %p2753_p9 = scmp.lt.u32.totalorder %s2751_s20, %s2746_s12  ;;  %p2755_p13 = scmp.lt.u32.totalorder %s2746_s12, %s3111_s22 }
  0x70   : > { %p2749_p4 = pnand %p2748_p2, %p2747_p12 }
  0x71   : > { %p2754_p10 = por %p2753_p9, %p2752_p7 }
  0x72   : > { %p2750_p5 = pneg %p2749_p4 }
  0x73   : > { %p2756_p1 = por %p2755_p13, %p2754_p10 }
  0x75   : > { %p2757_p3 = pnand %p2756_p1, %p2750_p5 }
  0x77   : > { %2760 = shalt.err (!%p2757_p3)
}
  0x78   : > { %s2761_s9 = scalar_lea.vmem %s3115_s13, 256  ;;  %s2907_s29 = smov [#allocation4]  }
  0x79   : > { %p2762_p6 = scmp.ne.s32.totalorder %s3115_s13, %s2761_s9  ;;  %s2766_s17 = sshll.u32 %s2907_s29, 4  ;;  %s2767_s17 = int_to_ptr.vmem [resolvable:$false] %s2766_s17 }
  0x7a   : > { %s2768_s10 = scalar_lea.vmem %s2767_s17, 512  ;;  %p2769_p12 = scmp.lt.s32.totalorder %s3115_s13, %s2767_s17 }
  0x7b   : > { %p2764_p8 = pnand %p2762_p6, %p2748_p2  ;;  %p2770_p4 = scmp.lt.s32.totalorder %s2768_s10, %s2761_s9 }
  0x7d   : > { %p2765_p11 = pneg %p2764_p8  ;;  %p2771_p7 = por %p2770_p4, %p2769_p12 }
  0x7f   : > { %p2772_p9 = pnand %p2771_p7, %p2765_p11 }
  0x81   : > { %2775 = shalt.err (!%p2772_p9)
}
  0x82   : > { %s2908_s12 = smov 384   ;;  %s2909_s20 = smov 128  }
  0x83   : > { %s2910_s21 = smov 8   ;;  %s2069_s18 = sshll.u32 %s3102_s16, 9 }
  0x84   : > { %2371 = dma.hbm_to_vmem [thread:$0]  (!%p3425_p0), %s3111_s22, 256, %s3115_s13, %s262_s8, %s2908_s12, %s2909_s20, %s2910_s21  }
  0x85   : > { %s2249_s29 = sshll.u32 %s2894_s27, 13  ;;  %s289_s14 = scalar_lea.vmem [#allocation7], %s2069_s18 }
  0x86   : > { %s3156_s10 = scalar_lea.hbm %s3398_s2, %s2249_s29  ;;  %s297_s23 = sshll.u32 %s289_s14, 4  ;;  %s3158_s23 = int_to_ptr.vmem [resolvable:$true] %s297_s23 }
  0x87   : > { %s3426_s1 = sand.u32 1, %s2898_s28   ;;  %s2776_s4 = scalar_lea.hbm %s3156_s10, 8192 }
  0x88   : > { %s3162_s3 = scalar_lea.sflag [#allocation8], %s3426_s1  ;;  %p2777_p5 = scmp.ne.s32.totalorder %s3156_s10, %s2776_s4 }
  0x89   : > { %s2781_s13 = scalar_lea.hbm %s3398_s2, 24576  ;;  %p2782_p1 = scmp.lt.u32.totalorder %s3156_s10, %s3398_s2 }
  0x8a   : > { %p2779_p10 = pnand %p2777_p5, %p2748_p2  ;;  %p2783_p3 = scmp.lt.u32.totalorder %s2781_s13, %s2776_s4 }
  0x8b   : > { %p2785_p8 = scmp.lt.u32.totalorder %s2776_s4, %s3156_s10 }
  0x8c   : > { %p2780_p13 = pneg %p2779_p10  ;;  %p2784_p6 = por %p2783_p3, %p2782_p1 }
  0x8e   : > { %p2786_p11 = por %p2785_p8, %p2784_p6 }
  0x90   : > { %p2787_p12 = pnand %p2786_p11, %p2780_p13 }
  0x92   : > { %2790 = shalt.err (!%p2787_p12)
}
  0x93   : > { %s2791_s1 = scalar_lea.vmem %s3158_s23, 8192  ;;  %s2911_s14 = smov [#allocation7]  }
  0x94   : > { %p2792_p4 = scmp.ne.s32.totalorder %s3158_s23, %s2791_s1  ;;  %s2796_s20 = sshll.u32 %s2911_s14, 4  ;;  %s2797_s20 = int_to_ptr.vmem [resolvable:$false] %s2796_s20 }
  0x95   : > { %s2798_s21 = scalar_lea.vmem %s2797_s20, 16384  ;;  %p2799_p5 = scmp.lt.s32.totalorder %s3158_s23, %s2797_s20 }
  0x96   : > { %p2794_p7 = pnand %p2792_p4, %p2748_p2  ;;  %p2800_p10 = scmp.lt.s32.totalorder %s2798_s21, %s2791_s1 }
  0x98   : > { %p2795_p9 = pneg %p2794_p7  ;;  %p2801_p1 = por %p2800_p10, %p2799_p5 }
  0x9a   : > { %p2802_p3 = pnand %p2801_p1, %p2795_p9 }
  0x9c   : > { %2805 = shalt.err (!%p2802_p3)
}
  0x9d   : > { %s3427_s4 = smov 16   ;;  %s3428_s18 = smov 256  }
  0x9e   : > { %2374 = dma.hbm_to_vmem [thread:$0]  (!%p3425_p0), %s3156_s10, 8192, %s3158_s23, %s3162_s3, %s3428_s18, %s3428_s18, %s3427_s4  }
  0x9f   : > { %p3429_p2 = scmp.ne.s32.totalorder %s3415_s7, 0 }
  0xa0   : > { %s311_s29 = sand.u32 (!%p3429_p2), 1, %s2882_s24   ;;  %p3430_p13 = scmp.ne.s32.totalorder (!%p3429_p2), %s3414_s30, 0 }
  0xa1   : > { %309 = sbr.rel (%p3429_p2) target bundleno = 1342 (0x53e), region = 44  ;;  %s2074_s9 = sshll.u32 (!%p3429_p2), %s311_s29, 4 }
  0xa2   : > { %s312_s17 = scalar_lea.sflag (!%p3429_p2), [#allocation5], %s311_s29  ;;  %s3194_s16 = scalar_lea.vmem (!%p3429_p2), [#allocation4], %s2074_s9 }
  0xa8   : > { %2857 = dma.done.wait (%p3430_p13), %s312_s17, 256  }
  0xa9   : > { %2859 = vsyncadd (%p3430_p13), %s312_s17, 4294967040  ;;  %s320_s11 = sand.u32 1, %s2984_s0   ;;  %s2075_s22 = sshll.u32 %s311_s29, 9 }
  0xaa   : > { %s321_s3 = scalar_lea.sflag [#allocation8], %s320_s11  ;;  %s3201_s23 = scalar_lea.vmem [#allocation7], %s2075_s22 }
  0xab   : > { %2861 = dma.done.wait (%p3430_p13), %s321_s3, 8192  }
  0xac   : > { %2863 = vsyncadd (%p3430_p13), %s321_s3, 4294959104  ;;  %p3431_p0 = scmp.eq.s32.totalorder %s2984_s0, 0 }
  0xae   : > { %2865 = dma.done.wait (%p3431_p0), [#allocation8], 4096   ;;  %p3432_p6 = pmov %p3431_p0 }
  0xaf   : > { %p3433_p8 = pmov %p3431_p0 }
  0xb0   : > { %2867 = vsyncadd (%p3432_p6), [#allocation8], 4294963200 }
  0xb1   : > { %2869 = dma.done.wait (%p3433_p8), [#allocation11], 8192   ;;  %p3434_p11 = pmov %p3431_p0 }
  0xb2   : > { %p2079_p12 = scmp.ne.s32.totalorder %s2890_s26, 0 }
  0xb3   : > { %2871 = vsyncadd (%p3434_p11), [#allocation11], 4294959104  ;;  %v2912_v0 = vmov (!%p2079_p12), 0.0  }
  0xb4   : > { %373 = sbr.rel (%p2079_p12) target bundleno = 187 (0xbb), region = 68  ;;  %374 = vst [vmem:[#allocation2] sm:$0xff] (!%p2079_p12), %v2912_v0  ;;  %375 = vst [vmem:[#allocation2 + $0x8] sm:$0xff] (!%p2079_p12), %v2912_v0 }
  0xb5   : > { %376 = vst [vmem:[#allocation2 + $0x10] sm:$0xff] (!%p2079_p12), %v2912_v0  ;;  %377 = vst [vmem:[#allocation2 + $0x18] sm:$0xff] (!%p2079_p12), %v2912_v0 }
  0xb6   : > { %378 = vst [vmem:[#allocation2 + $0x20] sm:$0xff] (!%p2079_p12), %v2912_v0  ;;  %379 = vst [vmem:[#allocation2 + $0x28] sm:$0xff] (!%p2079_p12), %v2912_v0 }
  0xb7   : > { %380 = vst [vmem:[#allocation2 + $0x30] sm:$0xff] (!%p2079_p12), %v2912_v0  ;;  %381 = vst [vmem:[#allocation2 + $0x38] sm:$0xff] (!%p2079_p12), %v2912_v0 }
  0xbb PF: > { %v2447_v1 = vld [vmem:[%s3201_s23 + $0x4] ss:$16 sps:$4 sm:$0xff]   ;;  %v2449_v2 = vld [vmem:[%s3201_s23 + $0xc] ss:$16 sps:$4 sm:$0xff]   ;;  %v2451_v3 = vld [vmem:[%s3201_s23] ss:$16 sps:$4 sm:$0xff]  }
  0xbc   : > { %786 = vmatprep.subr.bf16.mxu0 %v2447_v1  ;;  %v2452_v4 = vld [vmem:[%s3201_s23 + $0x8] ss:$16 sps:$4 sm:$0xff]   ;;  %829 = vmatprep.subr.bf16.mxu1 %v2449_v2  ;;  %v2453_v5 = vld [vmem:[%s3201_s23 + $0x24] ss:$16 sps:$4 sm:$0xff]   ;;  %v2455_v6 = vld [vmem:[%s3201_s23 + $0x2c] ss:$16 sps:$4 sm:$0xff]  }
  0xbd   : > { %787 = vmatpush1.bf16.msra.mxu0 %v2451_v3  ;;  %830 = vmatpush1.bf16.msra.mxu1 %v2452_v4  ;;  %v2457_v7 = vld [vmem:[%s3201_s23 + $0x20] ss:$16 sps:$4 sm:$0xff]   ;;  %v2458_v8 = vld [vmem:[%s3201_s23 + $0x28] ss:$16 sps:$4 sm:$0xff]   ;;  %v2459_v9 = vld [vmem:[%s3201_s23 + $0x44] ss:$16 sps:$4 sm:$0xff]  }
  0xbe   : > { %788 = vmatprep.subr.bf16.mxu0 %v2453_v5  ;;  %831 = vmatprep.subr.bf16.mxu1 %v2455_v6  ;;  %v2461_v10 = vld [vmem:[%s3201_s23 + $0x4c] ss:$16 sps:$4 sm:$0xff]   ;;  %v2463_v11 = vld [vmem:[%s3201_s23 + $0x40] ss:$16 sps:$4 sm:$0xff]   ;;  %v2464_v12 = vld [vmem:[%s3201_s23 + $0x48] ss:$16 sps:$4 sm:$0xff]  }
  0xbf   : > { %v2465_v13 = vld [vmem:[%s3201_s23 + $0x64] ss:$16 sps:$4 sm:$0xff]   ;;  %v2467_v14 = vld [vmem:[%s3201_s23 + $0x6c] ss:$16 sps:$4 sm:$0xff]   ;;  %v2469_v15 = vld [vmem:[%s3201_s23 + $0x60] ss:$16 sps:$4 sm:$0xff]  }
  0xc0   : > { %v2470_v16 = vld [vmem:[%s3201_s23 + $0x68] ss:$16 sps:$4 sm:$0xff]   ;;  %v2471_v17 = vld [vmem:[%s3201_s23 + $0x84] ss:$16 sps:$4 sm:$0xff]   ;;  %v2473_v18 = vld [vmem:[%s3201_s23 + $0x8c] ss:$16 sps:$4 sm:$0xff]  }
  0xc1   : > { %789 = vmatpush1.bf16.msra.mxu0 %v2457_v7  ;;  %832 = vmatpush1.bf16.msra.mxu1 %v2458_v8  ;;  %v2475_v19 = vld [vmem:[%s3201_s23 + $0x80] ss:$16 sps:$4 sm:$0xff]   ;;  %v2476_v20 = vld [vmem:[%s3201_s23 + $0x88] ss:$16 sps:$4 sm:$0xff]   ;;  %v2477_v21 = vld [vmem:[%s3201_s23 + $0xa4] ss:$16 sps:$4 sm:$0xff]  }
  0xc2   : > { %790 = vmatprep.subr.bf16.mxu0 %v2459_v9  ;;  %833 = vmatprep.subr.bf16.mxu1 %v2461_v10  ;;  %v2479_v22 = vld [vmem:[%s3201_s23 + $0xac] ss:$16 sps:$4 sm:$0xff]   ;;  %v2481_v23 = vld [vmem:[%s3201_s23 + $0xa0] ss:$16 sps:$4 sm:$0xff]   ;;  %v2482_v24 = vld [vmem:[%s3201_s23 + $0xa8] ss:$16 sps:$4 sm:$0xff]  }
  0xc3   : > { %v2483_v25 = vld [vmem:[%s3201_s23 + $0xc4] ss:$16 sps:$4 sm:$0xff]   ;;  %v2485_v26 = vld [vmem:[%s3201_s23 + $0xcc] ss:$16 sps:$4 sm:$0xff]   ;;  %v2487_v27 = vld [vmem:[%s3201_s23 + $0xc0] ss:$16 sps:$4 sm:$0xff]  }
  0xc4   : > { %v2488_v28 = vld [vmem:[%s3201_s23 + $0xc8] ss:$16 sps:$4 sm:$0xff]   ;;  %v2489_v29 = vld [vmem:[%s3201_s23 + $0xe4] ss:$16 sps:$4 sm:$0xff]   ;;  %v2491_v30 = vld [vmem:[%s3201_s23 + $0xec] ss:$16 sps:$4 sm:$0xff]  }
  0xc5   : > { %791 = vmatpush1.bf16.msra.mxu0 %v2463_v11  ;;  %834 = vmatpush1.bf16.msra.mxu1 %v2464_v12  ;;  %v2493_v31 = vld [vmem:[%s3201_s23 + $0xe0] ss:$16 sps:$4 sm:$0xff]   ;;  %v2494_v32 = vld [vmem:[%s3201_s23 + $0xe8] ss:$16 sps:$4 sm:$0xff]   ;;  %v2495_v33 = vld [vmem:[%s3201_s23 + $0x104] ss:$16 sps:$4 sm:$0xff]  }
  0xc6   : > { %792 = vmatprep.subr.bf16.mxu0 %v2465_v13  ;;  %835 = vmatprep.subr.bf16.mxu1 %v2467_v14  ;;  %v2497_v34 = vld [vmem:[%s3201_s23 + $0x10c] ss:$16 sps:$4 sm:$0xff]   ;;  %v2499_v35 = vld [vmem:[%s3201_s23 + $0x100] ss:$16 sps:$4 sm:$0xff]   ;;  %v2500_v36 = vld [vmem:[%s3201_s23 + $0x108] ss:$16 sps:$4 sm:$0xff]  }
  0xc7   : > { %v2501_v37 = vld [vmem:[%s3201_s23 + $0x124] ss:$16 sps:$4 sm:$0xff]   ;;  %v2503_v38 = vld [vmem:[%s3201_s23 + $0x12c] ss:$16 sps:$4 sm:$0xff]   ;;  %v2505_v39 = vld [vmem:[%s3201_s23 + $0x120] ss:$16 sps:$4 sm:$0xff]  }
  0xc8   : > { %v2506_v40 = vld [vmem:[%s3201_s23 + $0x128] ss:$16 sps:$4 sm:$0xff]   ;;  %v2507_v41 = vld [vmem:[%s3201_s23 + $0x144] ss:$16 sps:$4 sm:$0xff]   ;;  %v2509_v42 = vld [vmem:[%s3201_s23 + $0x14c] ss:$16 sps:$4 sm:$0xff]  }
  0xc9   : > { %793 = vmatpush1.bf16.msra.mxu0 %v2469_v15  ;;  %836 = vmatpush1.bf16.msra.mxu1 %v2470_v16  ;;  %v2511_v43 = vld [vmem:[%s3201_s23 + $0x140] ss:$16 sps:$4 sm:$0xff]   ;;  %v2512_v44 = vld [vmem:[%s3201_s23 + $0x148] ss:$16 sps:$4 sm:$0xff]   ;;  %v2513_v45 = vld [vmem:[%s3201_s23 + $0x164] ss:$16 sps:$4 sm:$0xff]  }
  0xca   : > { %794 = vmatprep.subr.bf16.mxu0 %v2471_v17  ;;  %837 = vmatprep.subr.bf16.mxu1 %v2473_v18  ;;  %v2515_v46 = vld [vmem:[%s3201_s23 + $0x16c] ss:$16 sps:$4 sm:$0xff]   ;;  %v2517_v48 = vld [vmem:[%s3201_s23 + $0x160] ss:$16 sps:$4 sm:$0xff]   ;;  %v2518_v49 = vld [vmem:[%s3201_s23 + $0x168] ss:$16 sps:$4 sm:$0xff]  }
  0xcb   : > { %v2545_v47 = vld [vmem:[%s3194_s16 + $0x4] ss:$8 sps:$4 sm:$0xff]   ;;  %v2523_v52 = vld [vmem:[%s3201_s23 + $0x180] ss:$16 sps:$4 sm:$0xff]   ;;  %v2524_v53 = vld [vmem:[%s3201_s23 + $0x188] ss:$16 sps:$4 sm:$0xff]  }
  0xcc   : > { %v2519_v50 = vld [vmem:[%s3201_s23 + $0x184] ss:$16 sps:$4 sm:$0xff]   ;;  %v2521_v51 = vld [vmem:[%s3201_s23 + $0x18c] ss:$16 sps:$4 sm:$0xff]   ;;  %818 = vmatprep.mubr.bf16.mxu0 %v2545_v47  ;;  %861 = vmatprep.mubr.bf16.mxu1 %v2545_v47  ;;  %v2529_v56 = vld [vmem:[%s3201_s23 + $0x1a0] ss:$16 sps:$4 sm:$0xff]  }
  0xcd   : > { %795 = vmatpush1.bf16.msra.mxu0 %v2475_v19  ;;  %838 = vmatpush1.bf16.msra.mxu1 %v2476_v20  ;;  %v2525_v54 = vld [vmem:[%s3201_s23 + $0x1a4] ss:$16 sps:$4 sm:$0xff]   ;;  %v2527_v55 = vld [vmem:[%s3201_s23 + $0x1ac] ss:$16 sps:$4 sm:$0xff]   ;;  %v2530_v57 = vld [vmem:[%s3201_s23 + $0x1a8] ss:$16 sps:$4 sm:$0xff]  }
  0xce   : > { %796 = vmatprep.subr.bf16.mxu0 %v2477_v21  ;;  %839 = vmatprep.subr.bf16.mxu1 %v2479_v22  ;;  %v2531_v58 = vld [vmem:[%s3201_s23 + $0x1c4] ss:$16 sps:$4 sm:$0xff]   ;;  %v2533_v59 = vld [vmem:[%s3201_s23 + $0x1cc] ss:$16 sps:$4 sm:$0xff]   ;;  %v2535_v60 = vld [vmem:[%s3201_s23 + $0x1c0] ss:$16 sps:$4 sm:$0xff]  }
  0xcf   : > { %v2536_v61 = vld [vmem:[%s3201_s23 + $0x1c8] ss:$16 sps:$4 sm:$0xff]   ;;  %v2537_v62 = vld [vmem:[%s3201_s23 + $0x1e4] ss:$16 sps:$4 sm:$0xff]   ;;  %v2539_v63 = vld [vmem:[%s3201_s23 + $0x1ec] ss:$16 sps:$4 sm:$0xff]  }
  0xd0   : > { %v2541_v0 = vld [vmem:[%s3201_s23 + $0x1e0] ss:$16 sps:$4 sm:$0xff]   ;;  %v2542_v1 = vld [vmem:[%s3201_s23 + $0x1e8] ss:$16 sps:$4 sm:$0xff]   ;;  %p2146_p4 = scmp.ne.s32.totalorder %s2890_s26, 2 }
  0xd1   : > { %797 = vmatpush1.bf16.msra.mxu0 %v2481_v23  ;;  %840 = vmatpush1.bf16.msra.mxu1 %v2482_v24  ;;  %v2543_v2 = vld [vmem:[%s3194_s16] ss:$8 sps:$4 sm:$0xff]   ;;  %s1573_s26 = sld [smem:[#allocation3]] (!%p2146_p4) }
  0xd2   : > { %798 = vmatprep.subr.bf16.mxu0 %v2483_v25  ;;  %841 = vmatprep.subr.bf16.mxu1 %v2485_v26  ;;  %v382_v3 = vld [vmem:[#allocation2] sm:$0xff]  ;;  %v384_v4 = vld [vmem:[#allocation2 + $0x10] sm:$0xff]  ;;  %v383_v5 = vld [vmem:[#allocation2 + $0x8] sm:$0xff] }
  0xd3   : > { %v385_v6 = vld [vmem:[#allocation2 + $0x18] sm:$0xff]  ;;  %v386_v9 = vld [vmem:[#allocation2 + $0x20] sm:$0xff]  ;;  %v388_v10 = vld [vmem:[#allocation2 + $0x30] sm:$0xff] }
  0xd4   : > { %v387_v15 = vld [vmem:[#allocation2 + $0x28] sm:$0xff]  ;;  %v389_v16 = vld [vmem:[#allocation2 + $0x38] sm:$0xff] }
  0xd5   : > { %799 = vmatpush1.bf16.msra.mxu0 %v2487_v27  ;;  %842 = vmatpush1.bf16.msra.mxu1 %v2488_v28  ;;  %v2546_v27 = vld [vmem:[#allocation9 + $0x40] sm:$0xff] (!%p2146_p4)   ;;  %v2566_v47 = vld [vmem:[#allocation9 + $0x68] sm:$0xff] (!%p2146_p4)  }
  0xd6   : > { %800 = vmatprep.subr.bf16.mxu0 %v2489_v29  ;;  %843 = vmatprep.subr.bf16.mxu1 %v2491_v30  ;;  %v2547_v28 = vld [vmem:[#allocation9 + $0xc0] sm:$0xff] (!%p2146_p4)  }
  0xd7   : > { %v2548_v29 = vld [vmem:[#allocation9] sm:$0xff] (!%p2146_p4)  }
  0xd8   : > { %v2549_v30 = vld [vmem:[#allocation9 + $0x80] sm:$0xff] (!%p2146_p4)  }
  0xd9   : > { %801 = vmatpush1.bf16.msra.mxu0 %v2493_v31  ;;  %844 = vmatpush1.bf16.msra.mxu1 %v2494_v32  ;;  %v2550_v31 = vld [vmem:[#allocation9 + $0x48] sm:$0xff] (!%p2146_p4)  }
  0xda   : > { %802 = vmatprep.subr.bf16.mxu0 %v2495_v33  ;;  %845 = vmatprep.subr.bf16.mxu1 %v2497_v34  ;;  %v2551_v32 = vld [vmem:[#allocation9 + $0xc8] sm:$0xff] (!%p2146_p4)  }
  0xdb   : > { %v2552_v33 = vld [vmem:[#allocation9 + $0x8] sm:$0xff] (!%p2146_p4)  }
  0xdc   : > { %v2553_v34 = vld [vmem:[#allocation9 + $0x88] sm:$0xff] (!%p2146_p4)  }
  0xdd   : > { %803 = vmatpush1.bf16.msra.mxu0 %v2499_v35  ;;  %846 = vmatpush1.bf16.msra.mxu1 %v2500_v36  ;;  %v2554_v35 = vld [vmem:[#allocation9 + $0x50] sm:$0xff] (!%p2146_p4)  }
  0xde   : > { %804 = vmatprep.subr.bf16.mxu0 %v2501_v37  ;;  %847 = vmatprep.subr.bf16.mxu1 %v2503_v38  ;;  %v2555_v36 = vld [vmem:[#allocation9 + $0xd0] sm:$0xff] (!%p2146_p4)  }
  0xdf   : > { %v2556_v37 = vld [vmem:[#allocation9 + $0x10] sm:$0xff] (!%p2146_p4)  }
  0xe0   : > { %v2557_v38 = vld [vmem:[#allocation9 + $0x90] sm:$0xff] (!%p2146_p4)  }
  0xe1   : > { %805 = vmatpush1.bf16.msra.mxu0 %v2505_v39  ;;  %848 = vmatpush1.bf16.msra.mxu1 %v2506_v40  ;;  %v2558_v39 = vld [vmem:[#allocation9 + $0x58] sm:$0xff] (!%p2146_p4)  }
  0xe2   : > { %806 = vmatprep.subr.bf16.mxu0 %v2507_v41  ;;  %849 = vmatprep.subr.bf16.mxu1 %v2509_v42  ;;  %v2559_v40 = vld [vmem:[#allocation9 + $0xd8] sm:$0xff] (!%p2146_p4)  }
  0xe3   : > { %v2560_v41 = vld [vmem:[#allocation9 + $0x18] sm:$0xff] (!%p2146_p4)  }
  0xe4   : > { %v2561_v42 = vld [vmem:[#allocation9 + $0x98] sm:$0xff] (!%p2146_p4)  }
  0xe5   : > { %807 = vmatpush1.bf16.msra.mxu0 %v2511_v43  ;;  %850 = vmatpush1.bf16.msra.mxu1 %v2512_v44  ;;  %v2562_v43 = vld [vmem:[#allocation9 + $0x60] sm:$0xff] (!%p2146_p4)  }
  0xe6   : > { %808 = vmatprep.subr.bf16.mxu0 %v2513_v45  ;;  %851 = vmatprep.subr.bf16.mxu1 %v2515_v46  ;;  %v2563_v44 = vld [vmem:[#allocation9 + $0xe0] sm:$0xff] (!%p2146_p4)  }
  0xe7   : > { %v2564_v45 = vld [vmem:[#allocation9 + $0x20] sm:$0xff] (!%p2146_p4)  }
  0xe8   : > { %v2565_v46 = vld [vmem:[#allocation9 + $0xa0] sm:$0xff] (!%p2146_p4)  }
  0xe9   : > { %809 = vmatpush1.bf16.msra.mxu0 %v2517_v48  ;;  %852 = vmatpush1.bf16.msra.mxu1 %v2518_v49  ;;  %v2567_v48 = vld [vmem:[#allocation9 + $0xe8] sm:$0xff] (!%p2146_p4)  }
  0xea   : > { %810 = vmatprep.subr.bf16.mxu0 %v2519_v50  ;;  %853 = vmatprep.subr.bf16.mxu1 %v2521_v51  ;;  %v2568_v49 = vld [vmem:[#allocation9 + $0x28] sm:$0xff] (!%p2146_p4)   ;;  %v2570_v51 = vld [vmem:[#allocation9 + $0x70] sm:$0xff] (!%p2146_p4)  }
  0xeb   : > { %v2569_v50 = vld [vmem:[#allocation9 + $0xa8] sm:$0xff] (!%p2146_p4)  }
  0xed   : > { %811 = vmatpush1.bf16.msra.mxu0 %v2523_v52  ;;  %854 = vmatpush1.bf16.msra.mxu1 %v2524_v53  ;;  %v2571_v52 = vld [vmem:[#allocation9 + $0xf0] sm:$0xff] (!%p2146_p4)  }
  0xee   : > { %812 = vmatprep.subr.bf16.mxu0 %v2525_v54  ;;  %855 = vmatprep.subr.bf16.mxu1 %v2527_v55  ;;  %v2572_v53 = vld [vmem:[#allocation9 + $0x30] sm:$0xff] (!%p2146_p4)   ;;  %v2574_v55 = vld [vmem:[#allocation9 + $0x78] sm:$0xff] (!%p2146_p4)  }
  0xef   : > { %v2573_v54 = vld [vmem:[#allocation9 + $0xb0] sm:$0xff] (!%p2146_p4)  }
  0xf1   : > { %813 = vmatpush1.bf16.msra.mxu0 %v2529_v56  ;;  %856 = vmatpush1.bf16.msra.mxu1 %v2530_v57  ;;  %v2575_v56 = vld [vmem:[#allocation9 + $0xf8] sm:$0xff] (!%p2146_p4)  }
  0xf2   : > { %814 = vmatprep.subr.bf16.mxu0 %v2531_v58  ;;  %857 = vmatprep.subr.bf16.mxu1 %v2533_v59  ;;  %v2576_v57 = vld [vmem:[#allocation9 + $0x38] sm:$0xff] (!%p2146_p4)  }
  0xf3   : > { %v2577_v58 = vld [vmem:[#allocation9 + $0xb8] sm:$0xff] (!%p2146_p4)  }
  0xf5   : > { %815 = vmatpush1.bf16.msra.mxu0 %v2535_v60  ;;  %858 = vmatpush1.bf16.msra.mxu1 %v2536_v61 }
  0xf6   : > { %816 = vmatprep.subr.bf16.mxu0 %v2537_v62  ;;  %859 = vmatprep.subr.bf16.mxu1 %v2539_v63 }
  0xf9   : > { %817 = vmatpush1.bf16.msra.mxu0 %v2541_v0  ;;  %860 = vmatpush1.bf16.msra.mxu1 %v2542_v1 }
  0xfa   : > { %2250 = vmatprep.subr.bf16.mxu0 (!%p2146_p4), %v2546_v27  ;;  %2272 = vmatprep.subr.bf16.mxu1 (!%p2146_p4), %v2547_v28  ;;  %v2610_v27 = vld [vmem:[#allocation10 + $0xa4] ss:$16 sps:$4 sm:$0xff] (!%p2146_p4)   ;;  %v2613_v28 = vld [vmem:[#allocation10 + $0xac] ss:$16 sps:$4 sm:$0xff] (!%p2146_p4)  }
  0xfc   : > { %819 = vmatmul.mubr.bf16.vlgmr.msra.gmra.mrb[0].mxu0 %v2543_v2  ;;  %862 = vmatmul.mubr.bf16.vlgmr.msra.gmra.mrb[0].mxu1 %v2543_v2 }
  0xfd   : > { %2251 = vmatpush3.bf16.msra.mxu0 (!%p2146_p4), %v2548_v29  ;;  %2273 = vmatpush3.bf16.msra.mxu1 (!%p2146_p4), %v2549_v30  ;;  %v2608_v29 = vld [vmem:[#allocation10 + $0xa0] ss:$16 sps:$4 sm:$0xff] (!%p2146_p4)   ;;  %v2611_v30 = vld [vmem:[#allocation10 + $0xa8] ss:$16 sps:$4 sm:$0xff] (!%p2146_p4)  }
  0xfe   : > { %2252 = vmatprep.subr.bf16.mxu0 (!%p2146_p4), %v2550_v31  ;;  %2274 = vmatprep.subr.bf16.mxu1 (!%p2146_p4), %v2551_v32  ;;  %v2616_v31 = vld [vmem:[#allocation10 + $0xc4] ss:$16 sps:$4 sm:$0xff] (!%p2146_p4)   ;;  %v2619_v32 = vld [vmem:[#allocation10 + $0xcc] ss:$16 sps:$4 sm:$0xff] (!%p2146_p4)  }
 0x101   : > { %2253 = vmatpush3.bf16.msra.mxu0 (!%p2146_p4), %v2552_v33  ;;  %2275 = vmatpush3.bf16.msra.mxu1 (!%p2146_p4), %v2553_v34  ;;  %v2614_v33 = vld [vmem:[#allocation10 + $0xc0] ss:$16 sps:$4 sm:$0xff] (!%p2146_p4)   ;;  %v2617_v34 = vld [vmem:[#allocation10 + $0xc8] ss:$16 sps:$4 sm:$0xff] (!%p2146_p4)  }
 0x102   : > { %2254 = vmatprep.subr.bf16.mxu0 (!%p2146_p4), %v2554_v35  ;;  %2276 = vmatprep.subr.bf16.mxu1 (!%p2146_p4), %v2555_v36  ;;  %v2622_v35 = vld [vmem:[#allocation10 + $0xe4] ss:$16 sps:$4 sm:$0xff] (!%p2146_p4)   ;;  %v2625_v36 = vld [vmem:[#allocation10 + $0xec] ss:$16 sps:$4 sm:$0xff] (!%p2146_p4)  }
 0x105   : > { %2255 = vmatpush3.bf16.msra.mxu0 (!%p2146_p4), %v2556_v37  ;;  %2277 = vmatpush3.bf16.msra.mxu1 (!%p2146_p4), %v2557_v38  ;;  %v2620_v37 = vld [vmem:[#allocation10 + $0xe0] ss:$16 sps:$4 sm:$0xff] (!%p2146_p4)   ;;  %v2623_v38 = vld [vmem:[#allocation10 + $0xe8] ss:$16 sps:$4 sm:$0xff] (!%p2146_p4)  }
 0x106   : > { %2256 = vmatprep.subr.bf16.mxu0 (!%p2146_p4), %v2558_v39  ;;  %2278 = vmatprep.subr.bf16.mxu1 (!%p2146_p4), %v2559_v40  ;;  %v2913_v39 = vmov (!%p2146_p4), 0  }
 0x109   : > { %2257 = vmatpush3.bf16.msra.mxu0 (!%p2146_p4), %v2560_v41  ;;  %2279 = vmatpush3.bf16.msra.mxu1 (!%p2146_p4), %v2561_v42 }
 0x10a   : > { %2258 = vmatprep.subr.bf16.mxu0 (!%p2146_p4), %v2562_v43  ;;  %2280 = vmatprep.subr.bf16.mxu1 (!%p2146_p4), %v2563_v44 }
 0x10d   : > { %2259 = vmatpush3.bf16.msra.mxu0 (!%p2146_p4), %v2564_v45  ;;  %2281 = vmatpush3.bf16.msra.mxu1 (!%p2146_p4), %v2565_v46 }
 0x10e   : > { %2260 = vmatprep.subr.bf16.mxu0 (!%p2146_p4), %v2566_v47  ;;  %2282 = vmatprep.subr.bf16.mxu1 (!%p2146_p4), %v2567_v48 }
 0x111   : > { %2261 = vmatpush3.bf16.msra.mxu0 (!%p2146_p4), %v2568_v49  ;;  %2283 = vmatpush3.bf16.msra.mxu1 (!%p2146_p4), %v2569_v50 }
 0x112   : > { %2262 = vmatprep.subr.bf16.mxu0 (!%p2146_p4), %v2570_v51  ;;  %2284 = vmatprep.subr.bf16.mxu1 (!%p2146_p4), %v2571_v52 }
 0x115   : > { %2263 = vmatpush3.bf16.msra.mxu0 (!%p2146_p4), %v2572_v53  ;;  %2285 = vmatpush3.bf16.msra.mxu1 (!%p2146_p4), %v2573_v54 }
 0x116   : > { %2264 = vmatprep.subr.bf16.mxu0 (!%p2146_p4), %v2574_v55  ;;  %2286 = vmatprep.subr.bf16.mxu1 (!%p2146_p4), %v2575_v56 }
 0x119   : > { %2265 = vmatpush3.bf16.msra.mxu0 (!%p2146_p4), %v2576_v57  ;;  %2287 = vmatpush3.bf16.msra.mxu1 (!%p2146_p4), %v2577_v58  ;;  %v2626_v57 = vld [vmem:[#allocation12 + $0x40] sm:$0xff] (!%p2146_p4)  }
 0x11a   : > { %v2627_v58 = vld [vmem:[#allocation12 + $0xc0] sm:$0xff] (!%p2146_p4)  }
 0x1cf   : > { %v820_v7 = vpop.f32.mrb[0].mxu0  ;;  %v863_v8 = vpop.f32.mrb[0].mxu1  ;;  %891 = sbr.rel (%p2146_p4) target bundleno = 1316 (0x524), region = 72 }
 0x1d0   : > { %v872_v11 = vadd.f32 %v820_v7, %v382_v3  ;;  %v874_v12 = vadd.f32 %v863_v8, %v384_v4  ;;  %v822_v13 = vpop.f32.mrb[1].mxu0  ;;  %v865_v14 = vpop.f32.mrb[1].mxu1  ;;  %v2578_v7 = vld [vmem:[#allocation10] ss:$16 sps:$4 sm:$0xff] (!%p2146_p4)   ;;  %v2580_v8 = vld [vmem:[#allocation10 + $0x4] ss:$16 sps:$4 sm:$0xff] (!%p2146_p4)  }
 0x1d1   : > { %v873_v17 = vadd.f32 %v822_v13, %v383_v5  ;;  %v875_v18 = vadd.f32 %v865_v14, %v385_v6  ;;  %v824_v19 = vpop.f32.mrb[2].mxu0  ;;  %v867_v20 = vpop.f32.mrb[2].mxu1  ;;  %1437 = vmatprep.subr.bf16.mxu0 (!%p2146_p4), %v2580_v8  ;;  %v2587_v13 = vld [vmem:[#allocation10 + $0x28] ss:$16 sps:$4 sm:$0xff] (!%p2146_p4)   ;;  %v2589_v14 = vld [vmem:[#allocation10 + $0x2c] ss:$16 sps:$4 sm:$0xff] (!%p2146_p4)  }
 0x1d2   : > { %880 = vst [vmem:[#allocation2] sm:$0xff] %v872_v11  ;;  %882 = vst [vmem:[#allocation2 + $0x10] sm:$0xff] %v874_v12  ;;  %v876_v21 = vadd.f32 %v824_v19, %v386_v9  ;;  %v878_v22 = vadd.f32 %v867_v20, %v388_v10  ;;  %v826_v23 = vpop.f32.mrb[3].mxu0  ;;  %v869_v24 = vpop.f32.mrb[3].mxu1  ;;  %v2581_v9 = vld [vmem:[#allocation10 + $0x8] ss:$16 sps:$4 sm:$0xff] (!%p2146_p4)  }
 0x1d3   : > { %881 = vst [vmem:[#allocation2 + $0x8] sm:$0xff] %v873_v17  ;;  %883 = vst [vmem:[#allocation2 + $0x18] sm:$0xff] %v875_v18  ;;  %v877_v25 = vadd.f32 %v826_v23, %v387_v15  ;;  %v879_v26 = vadd.f32 %v869_v24, %v389_v16  ;;  %v2583_v10 = vld [vmem:[#allocation10 + $0xc] ss:$16 sps:$4 sm:$0xff] (!%p2146_p4)   ;;  %v2584_v11 = vld [vmem:[#allocation10 + $0x20] ss:$16 sps:$4 sm:$0xff] (!%p2146_p4)  }
 0x1d4   : > { %884 = vst [vmem:[#allocation2 + $0x20] sm:$0xff] %v876_v21  ;;  %886 = vst [vmem:[#allocation2 + $0x30] sm:$0xff] %v878_v22  ;;  %1480 = vmatprep.subr.bf16.mxu1 (!%p2146_p4), %v2583_v10  ;;  %v2586_v12 = vld [vmem:[#allocation10 + $0x24] ss:$16 sps:$4 sm:$0xff] (!%p2146_p4)   ;;  %v2590_v16 = vld [vmem:[#allocation10 + $0x40] ss:$16 sps:$4 sm:$0xff] (!%p2146_p4)  }
 0x1d5   : > { %885 = vst [vmem:[#allocation2 + $0x28] sm:$0xff] %v877_v25  ;;  %887 = vst [vmem:[#allocation2 + $0x38] sm:$0xff] %v879_v26  ;;  %v2592_v15 = vld [vmem:[#allocation10 + $0x44] ss:$16 sps:$4 sm:$0xff] (!%p2146_p4)   ;;  %v2595_v17 = vld [vmem:[#allocation10 + $0x4c] ss:$16 sps:$4 sm:$0xff] (!%p2146_p4)  }
 0x1d6   : > { %v2593_v18 = vld [vmem:[#allocation10 + $0x48] ss:$16 sps:$4 sm:$0xff]   ;;  %v2598_v19 = vld [vmem:[#allocation10 + $0x64] ss:$16 sps:$4 sm:$0xff]   ;;  %v2601_v20 = vld [vmem:[#allocation10 + $0x6c] ss:$16 sps:$4 sm:$0xff]  }
 0x1d7   : > { %v2596_v21 = vld [vmem:[#allocation10 + $0x60] ss:$16 sps:$4 sm:$0xff]   ;;  %v2599_v22 = vld [vmem:[#allocation10 + $0x68] ss:$16 sps:$4 sm:$0xff]   ;;  %v2604_v23 = vld [vmem:[#allocation10 + $0x84] ss:$16 sps:$4 sm:$0xff]  }
 0x1d8   : > { %v2607_v24 = vld [vmem:[#allocation10 + $0x8c] ss:$16 sps:$4 sm:$0xff]   ;;  %v2602_v25 = vld [vmem:[#allocation10 + $0x80] ss:$16 sps:$4 sm:$0xff]   ;;  %v2605_v26 = vld [vmem:[#allocation10 + $0x88] ss:$16 sps:$4 sm:$0xff]  }
 0x1d9   : > { %v3293_v0 = vld [vmem:[#allocation2] sm:$0xff]  ;;  %v3299_v3 = vld [vmem:[#allocation2 + $0x10] sm:$0xff]  ;;  %v2633_v8 = vld [vmem:[#allocation12 + $0x88] sm:$0xff]  }
 0x1da   : > { %v3283_v59 = vld [vmem:[#allocation2 + $0x8] sm:$0xff]  ;;  %v3287_v61 = vld [vmem:[#allocation2 + $0x18] sm:$0xff] }
 0x1db   : > { %v3297_v2 = vld [vmem:[#allocation2 + $0x20] sm:$0xff]  ;;  %v3303_v5 = vld [vmem:[#allocation2 + $0x30] sm:$0xff] }
 0x1dc   : > { %v3285_v60 = vld [vmem:[#allocation2 + $0x28] sm:$0xff]  ;;  %v3291_v63 = vld [vmem:[#allocation2 + $0x38] sm:$0xff]  ;;  %v900_v4 = vpack.c.bf16 %v3297_v2, %v3293_v0  ;;  %v902_v6 = vpack.c.bf16 %v3303_v5, %v3299_v3 }
 0x1dd   : > { %v901_v62 = vpack.c.bf16 %v3285_v60, %v3283_v59  ;;  %v903_v1 = vpack.c.bf16 %v3291_v63, %v3287_v61  ;;  %v1544_v10 = vmul.f32 0.8, %v3285_v60 }
 0x1df   : > { %1192 = vmatprep.mubr.bf16.mxu0 %v901_v62  ;;  %1233 = vmatprep.mubr.bf16.mxu1 %v903_v1  ;;  %v2628_v62 = vld [vmem:[#allocation12] sm:$0xff]  }
 0x1e0   : > { %1193 = vmatmul.mubr.bf16.vlgmr.msra.gmra.mrb[0].mxu0 %v900_v4  ;;  %1234 = vmatmul.mubr.bf16.vlgmr.msra.gmra.mrb[0].mxu1 %v902_v6  ;;  %v2629_v1 = vld [vmem:[#allocation12 + $0x80] sm:$0xff]   ;;  %v2630_v4 = vld [vmem:[#allocation12 + $0x48] sm:$0xff]  }
 0x1e1   : > { %1438 = vmatpush1.bf16.msra.mxu0 %v2578_v7  ;;  %1481 = vmatpush1.bf16.msra.mxu1 %v2581_v9  ;;  %v2631_v6 = vld [vmem:[#allocation12 + $0xc8] sm:$0xff]   ;;  %v1540_v9 = vmul.f32 0.8, %v3283_v59 }
 0x1e2   : > { %1439 = vmatprep.subr.bf16.mxu0 %v2586_v12  ;;  %1482 = vmatprep.subr.bf16.mxu1 %v2589_v14  ;;  %v2632_v7 = vld [vmem:[#allocation12 + $0x8] sm:$0xff]   ;;  %v1546_v12 = vmul.f32 0.8, %v3291_v63  ;;  %v1539_v14 = vmul.f32 0.8, %v3293_v0 }
 0x1e3   : > { %1469 = vmatprep.mubr.bf16.mxu0 %v2913_v39  ;;  %1512 = vmatprep.mubr.bf16.mxu1 %v2913_v39 }
 0x1e5   : > { %1440 = vmatpush1.bf16.msra.mxu0 %v2584_v11  ;;  %1483 = vmatpush1.bf16.msra.mxu1 %v2587_v13  ;;  %v1542_v11 = vmul.f32 0.8, %v3287_v61  ;;  %v1545_v61 = vmul.f32 0.8, %v3303_v5 }
 0x1e6   : > { %1441 = vmatprep.subr.bf16.mxu0 %v2592_v15  ;;  %1484 = vmatprep.subr.bf16.mxu1 %v2595_v17 }
 0x1e9   : > { %1442 = vmatpush1.bf16.msra.mxu0 %v2590_v16  ;;  %1485 = vmatpush1.bf16.msra.mxu1 %v2593_v18  ;;  %v1541_v16 = vmul.f32 0.8, %v3299_v3 }
 0x1ea   : > { %1443 = vmatprep.subr.bf16.mxu0 %v2598_v19  ;;  %1486 = vmatprep.subr.bf16.mxu1 %v2601_v20 }
 0x1ed   : > { %1444 = vmatpush1.bf16.msra.mxu0 %v2596_v21  ;;  %1487 = vmatpush1.bf16.msra.mxu1 %v2599_v22  ;;  %v1543_v21 = vmul.f32 0.8, %v3297_v2 }
 0x1ee   : > { %1445 = vmatprep.subr.bf16.mxu0 %v2604_v23  ;;  %1488 = vmatprep.subr.bf16.mxu1 %v2607_v24 }
 0x1f1   : > { %1446 = vmatpush1.bf16.msra.mxu0 %v2602_v25  ;;  %1489 = vmatpush1.bf16.msra.mxu1 %v2605_v26 }
 0x1f2   : > { %1447 = vmatprep.subr.bf16.mxu0 %v2610_v27  ;;  %1490 = vmatprep.subr.bf16.mxu1 %v2613_v28 }
 0x1f5   : > { %1448 = vmatpush1.bf16.msra.mxu0 %v2608_v29  ;;  %1491 = vmatpush1.bf16.msra.mxu1 %v2611_v30 }
 0x1f6   : > { %1449 = vmatprep.subr.bf16.mxu0 %v2616_v31  ;;  %1492 = vmatprep.subr.bf16.mxu1 %v2619_v32 }
 0x1f9   : > { %1450 = vmatpush1.bf16.msra.mxu0 %v2614_v33  ;;  %1493 = vmatpush1.bf16.msra.mxu1 %v2617_v34 }
 0x1fa   : > { %1451 = vmatprep.subr.bf16.mxu0 %v2622_v35  ;;  %1494 = vmatprep.subr.bf16.mxu1 %v2625_v36 }
 0x1fd   : > { %1452 = vmatpush1.bf16.msra.mxu0 %v2620_v37  ;;  %1495 = vmatpush1.bf16.msra.mxu1 %v2623_v38 }
 0x1fe   : > { %2294 = vmatprep.subr.bf16.mxu0 %v2626_v57  ;;  %2316 = vmatprep.subr.bf16.mxu1 %v2627_v58  ;;  %v2636_v57 = vld [vmem:[#allocation12 + $0x10] sm:$0xff]  }
 0x1ff   : > { %v2637_v58 = vld [vmem:[#allocation12 + $0x90] sm:$0xff]  }
 0x2b3   : > { %v2266_v40 = vpop.f32.mrb[0].mxu0  ;;  %v2288_v41 = vpop.f32.mrb[0].mxu1 }
 0x2b4   : > { %v2267_v42 = vpop.f32.mrb[1].mxu0  ;;  %v2289_v44 = vpop.f32.mrb[1].mxu1 }
 0x2b5   : > { %v2268_v43 = vadd.f32 %v2267_v42, %v2266_v40  ;;  %v2269_v45 = vpop.f32.mrb[2].mxu0  ;;  %v2290_v46 = vadd.f32 %v2289_v44, %v2288_v41  ;;  %v2291_v47 = vpop.f32.mrb[2].mxu1 }
 0x2b6   : > { %v2270_v48 = vpop.f32.mrb[3].mxu0  ;;  %v2292_v50 = vpop.f32.mrb[3].mxu1 }
 0x2b7   : > { %v2271_v49 = vadd.f32 %v2270_v48, %v2269_v45  ;;  %v1236_v51 = vadd.f32 %v2290_v46, %v2268_v43  ;;  %v2293_v52 = vadd.f32 %v2292_v50, %v2291_v47 }
 0x2b9   : > { %v1239_v53 = vadd.f32 %v2293_v52, %v2271_v49  ;;  %v1242_v54 = vmax.f32 %v1236_v51, 0.0 }
 0x2bb   : > { %v1243_v55 = vmax.f32 %v1239_v53, 0.0 }
 0x2bd   : > { %v1244_v56 = vpack.c.bf16 %v1243_v55, %v1242_v54  ;;  %v2634_v55 = vld [vmem:[#allocation12 + $0x50] sm:$0xff]  }
 0x2bf   : > { %1470 = vmatmul.mubr.bf16.vlgmr.msra.gmra.mrb[4].mxu0 %v1244_v56  ;;  %1513 = vmatmul.mubr.bf16.vlgmr.msra.gmra.mrb[4].mxu1 %v1244_v56  ;;  %v2635_v56 = vld [vmem:[#allocation12 + $0xd0] sm:$0xff]  }
 0x2c0   : > { %2295 = vmatpush3.bf16.msra.mxu0 %v2628_v62  ;;  %2317 = vmatpush3.bf16.msra.mxu1 %v2629_v1  ;;  %v2638_v62 = vld [vmem:[#allocation12 + $0x58] sm:$0xff]  }
 0x2c1   : > { %2296 = vmatprep.subr.bf16.mxu0 %v2630_v4  ;;  %2318 = vmatprep.subr.bf16.mxu1 %v2631_v6  ;;  %v2639_v1 = vld [vmem:[#allocation12 + $0xd8] sm:$0xff]  }
 0x2c2   : > { %v2640_v4 = vld [vmem:[#allocation12 + $0x18] sm:$0xff]  }
 0x2c3   : > { %v2641_v6 = vld [vmem:[#allocation12 + $0x98] sm:$0xff]  }
 0x2c4   : > { %2297 = vmatpush3.bf16.msra.mxu0 %v2632_v7  ;;  %2319 = vmatpush3.bf16.msra.mxu1 %v2633_v8  ;;  %v2642_v7 = vld [vmem:[#allocation12 + $0x60] sm:$0xff]  }
 0x2c5   : > { %2298 = vmatprep.subr.bf16.mxu0 %v2634_v55  ;;  %2320 = vmatprep.subr.bf16.mxu1 %v2635_v56  ;;  %v2643_v8 = vld [vmem:[#allocation12 + $0xe0] sm:$0xff]  }
 0x2c8   : > { %2299 = vmatpush3.bf16.msra.mxu0 %v2636_v57  ;;  %2321 = vmatpush3.bf16.msra.mxu1 %v2637_v58 }
 0x2c9   : > { %2300 = vmatprep.subr.bf16.mxu0 %v2638_v62  ;;  %2322 = vmatprep.subr.bf16.mxu1 %v2639_v1 }
 0x2cc   : > { %2301 = vmatpush3.bf16.msra.mxu0 %v2640_v4  ;;  %2323 = vmatpush3.bf16.msra.mxu1 %v2641_v6 }
 0x2cd   : > { %2302 = vmatprep.subr.bf16.mxu0 %v2642_v7  ;;  %2324 = vmatprep.subr.bf16.mxu1 %v2643_v8 }
 0x392   : > { %v1471_v13 = vpop.f32.mrb[4].mxu0  ;;  %v1514_v15 = vpop.f32.mrb[4].mxu1 }
 0x393   : > { %v1523_v17 = vmax.f32 %v1471_v13, 0.0  ;;  %v1525_v18 = vmax.f32 %v1514_v15, 0.0  ;;  %v1473_v19 = vpop.f32.mrb[5].mxu0  ;;  %v1516_v20 = vpop.f32.mrb[5].mxu1  ;;  %v2648_v13 = vld [vmem:[#allocation12 + $0x28] sm:$0xff]   ;;  %v2650_v15 = vld [vmem:[#allocation12 + $0x70] sm:$0xff]  }
 0x394   : > { %v1524_v22 = vmax.f32 %v1473_v19, 0.0  ;;  %v1526_v59 = vmax.f32 %v1516_v20, 0.0  ;;  %v1475_v23 = vpop.f32.mrb[6].mxu0  ;;  %v1518_v60 = vpop.f32.mrb[6].mxu1  ;;  %v2654_v19 = vld [vmem:[#allocation12 + $0x78] sm:$0xff]  }
 0x395   : > { %v1531_v24 = vmul.f32 0.2, %v1523_v17  ;;  %v1533_v63 = vmul.f32 0.2, %v1525_v18  ;;  %v1527_v25 = vmax.f32 %v1475_v23, 0.0  ;;  %v1529_v26 = vmax.f32 %v1518_v60, 0.0 }
 0x396   : > { %v1532_v0 = vmul.f32 0.2, %v1524_v22  ;;  %v1534_v27 = vmul.f32 0.2, %v1526_v59  ;;  %v1477_v28 = vpop.f32.mrb[7].mxu0  ;;  %v1520_v3 = vpop.f32.mrb[7].mxu1 }
 0x397   : > { %v3315_v29 = vadd.f32 %v1539_v14, %v1531_v24  ;;  %v3317_v30 = vadd.f32 %v1541_v16, %v1533_v63  ;;  %v1535_v31 = vmul.f32 0.2, %v1527_v25  ;;  %v1537_v2 = vmul.f32 0.2, %v1529_v26  ;;  %v2649_v14 = vld [vmem:[#allocation12 + $0xa8] sm:$0xff]   ;;  %v2651_v16 = vld [vmem:[#allocation12 + $0xf0] sm:$0xff]  }
 0x398   : > { %v3319_v32 = vadd.f32 %v1540_v9, %v1532_v0  ;;  %v3321_v33 = vadd.f32 %v1542_v11, %v1534_v27  ;;  %v1528_v34 = vmax.f32 %v1477_v28, 0.0  ;;  %v1530_v5 = vmax.f32 %v1520_v3, 0.0  ;;  %v2644_v9 = vld [vmem:[#allocation12 + $0x20] sm:$0xff]   ;;  %v2646_v11 = vld [vmem:[#allocation12 + $0x68] sm:$0xff]   ;;  %v2652_v17 = vld [vmem:[#allocation12 + $0x30] sm:$0xff]  }
 0x399   : > { %v1555_v35 = vmul.f32 %v3315_v29, %v3315_v29  ;;  %v3325_v36 = vadd.f32 %v1543_v21, %v1535_v31  ;;  %v3329_v40 = vadd.f32 %v1545_v61, %v1537_v2  ;;  %v1557_v41 = vmul.f32 %v3317_v30, %v3317_v30  ;;  %2303 = vmatpush3.bf16.msra.mxu0 %v2644_v9  ;;  %v2653_v18 = vld [vmem:[#allocation12 + $0xb0] sm:$0xff]   ;;  %v2655_v20 = vld [vmem:[#allocation12 + $0xf8] sm:$0xff]  }
 0x39a   : > { %v1556_v37 = vmul.f32 %v3319_v32, %v3319_v32  ;;  %v1536_v38 = vmul.f32 0.2, %v1528_v34  ;;  %v1538_v39 = vmul.f32 0.2, %v1530_v5  ;;  %v1558_v47 = vmul.f32 %v3321_v33, %v3321_v33  ;;  %2304 = vmatprep.subr.bf16.mxu0 %v2646_v11  ;;  %v2656_v21 = vld [vmem:[#allocation12 + $0x38] sm:$0xff]  }
 0x39b   : > { %v1559_v42 = vmul.f32 %v3325_v36, %v3325_v36  ;;  %v1561_v49 = vmul.f32 %v3329_v40, %v3329_v40  ;;  %v2657_v22 = vld [vmem:[#allocation12 + $0xb8] sm:$0xff]   ;;  %v1578_v24 = vstv %s1573_s26 }
 0x39c   : > { %v3335_v43 = vadd.f32 %v1544_v10, %v1536_v38  ;;  %v3337_v44 = vadd.f32 %v1546_v12, %v1538_v39  ;;  %v1563_v45 = vadd.f32 %v1556_v37, %v1555_v35  ;;  %v2645_v10 = vld [vmem:[#allocation12 + $0xa0] sm:$0xff]   ;;  %v2647_v12 = vld [vmem:[#allocation12 + $0xe8] sm:$0xff]  }
 0x39d   : > { %2325 = vmatpush3.bf16.msra.mxu1 %v2645_v10  ;;  %2305 = vmatpush3.bf16.msra.mxu0 %v2648_v13 }
 0x39e   : > { %v1560_v46 = vmul.f32 %v3335_v43, %v3335_v43  ;;  %v1564_v48 = vadd.f32 %v1563_v45, %v1557_v41  ;;  %v1562_v52 = vmul.f32 %v3337_v44, %v3337_v44  ;;  %2326 = vmatprep.subr.bf16.mxu1 %v2647_v12  ;;  %2306 = vmatprep.subr.bf16.mxu0 %v2650_v15 }
 0x3a0   : > { %v1565_v50 = vadd.f32 %v1564_v48, %v1558_v47  ;;  %v1568_v51 = vadd.f32 %v1560_v46, %v1559_v42 }
 0x3a1   : > { %2327 = vmatpush3.bf16.msra.mxu1 %v2649_v14  ;;  %2307 = vmatpush3.bf16.msra.mxu0 %v2652_v17 }
 0x3a2   : > { %1566 = vadd.xlane.f32.xlu0 %v1565_v50  ;;  %v1569_v53 = vadd.f32 %v1568_v51, %v1561_v49  ;;  %2328 = vmatprep.subr.bf16.mxu1 %v2651_v16 }
 0x3a3   : > { %2308 = vmatprep.subr.bf16.mxu0 %v2654_v19 }
 0x3a4   : > { %v1570_v54 = vadd.f32 %v1569_v53, %v1562_v52 }
 0x3a5   : > { %2329 = vmatpush3.bf16.msra.mxu1 %v2653_v18  ;;  %2309 = vmatpush3.bf16.msra.mxu0 %v2656_v21 }
 0x3a6   : > { %1571 = vadd.xlane.f32.xlu0 %v1570_v54  ;;  %2330 = vmatprep.subr.bf16.mxu1 %v2655_v20 }
 0x3a9   : > { %2331 = vmatpush3.bf16.msra.mxu1 %v2657_v22 }
 0x42f   : > { %v1567_v59 = vpop.xlane.xlu0 %1566 }
 0x430   : > { %v1574_v23 = vadd.f32 1e-12, %v1567_v59 }
 0x432   : > { %2658 = vrsqrt.f32 %v1574_v23 }
 0x433   : > { %v1572_v60 = vpop.xlane.xlu0 %1571 }
 0x434   : > { %v1575_v61 = vadd.f32 1e-12, %v1572_v60 }
 0x436   : > { %2660 = vrsqrt.f32 %v1575_v61 }
 0x43c   : > { %v2659_v63 = vpop.eup %2658 }
 0x43d   : > { %v1579_v25 = vmul.f32 %v2659_v63, %v1578_v24 }
 0x43f   : > { %v1582_v27 = vmul.f32 %v1579_v25, %v3319_v32  ;;  %v1584_v28 = vmul.f32 %v1579_v25, %v3321_v33  ;;  %v1581_v3 = vmul.f32 %v1579_v25, %v3315_v29  ;;  %v1583_v31 = vmul.f32 %v1579_v25, %v3317_v30 }
 0x440   : > { %v2661_v26 = vpop.eup %2660 }
 0x441   : > { %v1580_v0 = vmul.f32 %v2661_v26, %v1578_v24 }
 0x443   : > { %v1586_v2 = vmul.f32 %v1580_v0, %v3335_v43  ;;  %v1588_v34 = vmul.f32 %v1580_v0, %v3337_v44  ;;  %v1585_v5 = vmul.f32 %v1580_v0, %v3325_v36  ;;  %v1587_v35 = vmul.f32 %v1580_v0, %v3329_v40 }
 0x445   : > { %v1590_v37 = vpack.c.bf16 %v1586_v2, %v1582_v27  ;;  %v1592_v38 = vpack.c.bf16 %v1588_v34, %v1584_v28  ;;  %v1589_v39 = vpack.c.bf16 %v1585_v5, %v1581_v3  ;;  %v1591_v41 = vpack.c.bf16 %v1587_v35, %v1583_v31 }
 0x447   : > { %1881 = vmatprep.mubr.bf16.mxu0 %v1590_v37  ;;  %1922 = vmatprep.mubr.bf16.mxu1 %v1592_v38 }
 0x448   : > { %1882 = vmatmul.mubr.bf16.vlgmr.msra.gmra.mrb[8].mxu0 %v1589_v39  ;;  %1923 = vmatmul.mubr.bf16.vlgmr.msra.gmra.mrb[8].mxu1 %v1591_v41 }
 0x51b   : > { %v2310_v32 = vpop.f32.mrb[8].mxu0  ;;  %v2332_v29 = vpop.f32.mrb[8].mxu1 }
 0x51c   : > { %v2311_v33 = vpop.f32.mrb[9].mxu0  ;;  %v2333_v30 = vpop.f32.mrb[9].mxu1 }
 0x51d   : > { %v2312_v42 = vadd.f32 %v2311_v33, %v2310_v32  ;;  %v2334_v43 = vadd.f32 %v2333_v30, %v2332_v29  ;;  %v2313_v45 = vpop.f32.mrb[10].mxu0  ;;  %v2335_v44 = vpop.f32.mrb[10].mxu1 }
 0x51e   : > { %v2314_v46 = vpop.f32.mrb[11].mxu0  ;;  %v2336_v36 = vpop.f32.mrb[11].mxu1 }
 0x51f   : > { %v1925_v47 = vadd.f32 %v2334_v43, %v2312_v42  ;;  %v2315_v40 = vadd.f32 %v2314_v46, %v2313_v45  ;;  %v2337_v48 = vadd.f32 %v2336_v36, %v2335_v44 }
 0x521   : > { %1931 = vst [vmem:[#allocation13] sm:$0xff] %v1925_v47  ;;  %v1928_v49 = vadd.f32 %v2337_v48, %v2315_v40 }
 0x523   : > { %1932 = vst [vmem:[#allocation13 + $0x8] sm:$0xff] %v1928_v49 }
 0x524 PF: > { %p2382_p7 = scmp.eq.s32.totalorder %s2984_s0, 2  ;;  %s2914_s30 = smov [#allocation13]  }
 0x525   : > { %s1942_s7 = sshll.u32 %s2914_s30, 4  ;;  %s1943_s7 = int_to_ptr.vmem [resolvable:$true] %s1942_s7 }
 0x526   : > { %s2806_s10 = scalar_lea.vmem %s1943_s7, 256  ;;  %p2813_p1 = scmp.lt.s32.totalorder %s1943_s7, %s1943_s7 }
 0x527   : > { %p2807_p9 = scmp.ne.s32.totalorder %s1943_s7, %s2806_s10  ;;  %p2814_p3 = scmp.lt.s32.totalorder %s2806_s10, %s2806_s10 }
 0x529   : > { %p2808_p5 = pnand %p2807_p9, %p2382_p7  ;;  %p2815_p2 = por %p2814_p3, %p2813_p1 }
 0x52b   : > { %p2809_p10 = pneg %p2808_p5 }
 0x52d   : > { %p2816_p13 = pnand %p2815_p2, %p2809_p10 }
 0x52f   : > { %2819 = shalt.err (!%p2816_p13)
}
 0x530   : > { %s2820_s12 = scalar_lea.hbm %s3402_s6, 256 }
 0x531   : > { %p2821_p0 = scmp.ne.s32.totalorder %s3402_s6, %s2820_s12  ;;  %p2826_p11 = scmp.lt.u32.totalorder %s2820_s12, %s3402_s6 }
 0x533   : > { %p2822_p6 = pnand %p2821_p0, %p2382_p7 }
 0x535   : > { %p2823_p8 = pneg %p2822_p6 }
 0x537   : > { %p2828_p12 = pnand %p2826_p11, %p2823_p8 }
 0x539   : > { %2831 = shalt.err (!%p2828_p12)
}
 0x53a   : > { %s2915_s4 = smov 128   ;;  %s2916_s18 = smov 8  }
 0x53b   : > { %2355 = dma.vmem_to_hbm [thread:$0]  (%p2382_p7), %s1943_s7, 256, %s3402_s6, [#allocation6], %s2915_s4, %s2915_s4, %s2916_s18  }
 0x53c   : > { %2873 = dma.done.wait (%p2382_p7), [#allocation6], 256  }
 0x53d   : > { %2875 = vsyncadd (%p2382_p7), [#allocation6], 4294967040 }
 0x53e PF: > { %s25_s28 = sadd.s32 1, %s2898_s28   ;;  %s3435_s23 = smov %s2882_s24 }
 0x53f   : > { %p22_p4 = scmp.ge.s32.totalorder %s25_s28, 5   ;;  %s3436_s24 = smov %s2886_s25 }
 0x540   : > { %s3437_s25 = smov %s3120_s15  ;;  %s3438_s26 = smov %s2894_s27 }
 0x541   : > { %s3439_s27 = smov %s3441_s19  ;;  %24 = sbr.rel (!%p22_p4) target bundleno = 13 (0xd), region = 115 }
 0x548   :  { %1958 = vsyncpa [#allocation5], 1 }
 0x549   :  { %1960 = vsyncpa [#allocation5 + $0x1], 1 }
 0x54a   :  { %1961 = vsyncpa [#allocation8], 1 }
 0x54b   :  { %1963 = vsyncpa [#allocation8 + $0x1], 1 }
 0x54c   :  { %1964 = vsyncpa [#allocation11], 1 }
 0x54d   :  { %1965 = vsyncpa [#allocation6], 1 }
 0x54e   :  { %1967 = vsyncpa [#allocation6 + $0x1], 1 }

</bundles_post_ra>
